<compile_context>
chip_gen: v5e
topology: v5e:2x2
jax: 0.10.0
libtpu: 0.0.40
codegen_flags: <defaults>
</compile_context>

<pallas_src>
import functools

import jax
import jax.numpy as jnp
from jax.experimental import pallas as pl
from jax.experimental.pallas import tpu as pltpu

_MIB = 1024 * 1024
# Explicit capability check instead of a broad try/except around pallas_call.
_HAS_BUFFERED = hasattr(pl, "Buffered")


def _round_up(v, m):
    return ((v + m - 1) // m) * m


def _cdiv(a, b):
    return -(-a // b)


def _tpu_info():
    """Physical VMEM capacity and MXU N-dim alignment of the local chip."""
    vmem_cap = None
    try:  # narrow capability probe only; kernel errors are never swallowed here
        vmem_cap = int(pltpu.get_tpu_info().vmem_capacity_bytes)
    except Exception:
        vmem_cap = None
    kind = ""
    try:
        kind = jax.devices()[0].device_kind.lower()
    except Exception:
        kind = ""
    if vmem_cap is None:
        if "v7" in kind or "7x" in kind:
            vmem_cap = 64 * _MIB          # v7x: 64 MiB per TensorCore
        elif kind:
            vmem_cap = 128 * _MIB         # v4 / v5e / v6e
        else:
            vmem_cap = 64 * _MIB          # unknown: be conservative
    # MXU N dim: 256 on v6e/v7x, 128 on v5e and older generations.
    older = any(t in kind for t in ("v2", "v3", "v4", "v5"))
    n_align = 128 if older else 256
    return vmem_cap, n_align


def _need_bytes(tb, tk, in_size, out_p, x_item, w_item, out_item):
    """Conservative (double-buffered everywhere) VMEM footprint estimate."""
    need = 2 * tb * in_size * x_item                      # x tiles
    need += 2 * (in_size * tk + tk * out_p) * w_item      # W1 / W2 hidden-slices
    need += 2 * 8 * tk * 4                                # b1 slice (sublane-padded)
    need += 2 * 3 * 8 * out_p * 4                         # b2 / gamma / beta
    need += 2 * tb * out_p * out_item                     # out tiles
    need += tb * out_p * 4                                # f32 y accumulator scratch
    need += tb * (tk + out_p) * 4                         # f32 intermediates headroom
    return need


def _layernorm_relu_store(y_pre, b2_ref, g_ref, beta_ref, o_ref, *,
                          out_valid, out_p, no_relu):
    y = y_pre + b2_ref[...]                               # f32
    inv_n = 1.0 / float(out_valid)
    mean = jnp.sum(y, axis=-1, keepdims=True) * inv_n     # padded cols are exactly 0
    d = y - mean
    if out_p != out_valid:
        # Mask padded columns so the *centered* variance stays exact.
        lane = jax.lax.broadcasted_iota(jnp.int32, y.shape, 1)
        d = jnp.where(lane < out_valid, d, 0.0)
    var = jnp.sum(d * d, axis=-1, keepdims=True) * inv_n
    y_n = d * jax.lax.rsqrt(var + 1e-5)                   # eps: PyTorch LayerNorm default
    y_a = y_n * g_ref[...] + beta_ref[...]
    if not no_relu:
        y_a = jnp.maximum(y_a, 0.0)
    o_ref[...] = y_a.astype(o_ref.dtype)


def mlp_kernel(x_ref, w1_ref, b1_ref, w2_ref, b2_ref, g_ref, beta_ref,
               o_ref, y_acc, *, out_valid, out_p, nk, no_relu):
    cdt = w1_ref.dtype                     # MXU operand dtype (bf16 fast path by default)
    x = x_ref[...].astype(cdt)             # in-kernel cast: no extra HBM copy of x

    # fc1 for this hidden slice (f32 accumulation on the MXU) + bias slice.
    h = jnp.dot(x, w1_ref[...], preferred_element_type=jnp.float32) + b1_ref[...]
    # fc2 partial product for this hidden slice.
    part = jnp.dot(h.astype(cdt), w2_ref[...], preferred_element_type=jnp.float32)

    if nk == 1:
        _layernorm_relu_store(part, b2_ref, g_ref, beta_ref, o_ref,
                              out_valid=out_valid, out_p=out_p, no_relu=no_relu)
    else:
        k = pl.program_id(1)

        @pl.when(k == 0)
        def _():
            y_acc[...] = jnp.zeros_like(y_acc)

        y_acc[...] += part

        @pl.when(k == nk - 1)
        def _():
            _layernorm_relu_store(y_acc[...], b2_ref, g_ref, beta_ref, o_ref,
                                  out_valid=out_valid, out_p=out_p, no_relu=no_relu)


def prepare_mlp_params(w1, b1, w2, b2, gamma, beta, *,
                       compute_dtype=jnp.bfloat16, max_batch_tile=512,
                       hidden_block=None):
    """One-time parameter preparation (cast + pad + tiling plan).

    w1: [inputSize, hiddenSize]   (transposed PyTorch fc1.weight)
    b1: [hiddenSize]
    w2: [hiddenSize, outputSize]  (transposed PyTorch fc2.weight)
    b2, gamma, beta: [outputSize]
    compute_dtype: MXU operand dtype (bf16 default; f32 for exact parity;
                   fp8 is possible on v7x).  Accumulation / LayerNorm stay f32.
    """
    in_size, hidden = w1.shape
    out_size = w2.shape[1]
    vmem_cap, n_align = _tpu_info()

    cdt = jnp.dtype(compute_dtype) if compute_dtype is not None else jnp.dtype(w1.dtype)
    w_item = cdt.itemsize
    sub = {4: 8, 2: 16, 1: 32}.get(w_item, 8)   # sublane packing of the compute dtype

    # Lane-dense output width, MXU-N aligned once it exceeds one 128 tile.
    out_p = _round_up(out_size, 128 if out_size <= 128 else n_align)

    # Hidden-dim (fc2-K) tiling plan sized against this chip's VMEM.
    budget = int(vmem_cap * 0.75)
    x_item = out_item = 4                      # plan with f32 activations (upper bound)
    hidden_al = _round_up(hidden, 128)
    if hidden_block is not None:
        tk = max(128, _round_up(int(hidden_block), 128))
        nk = _cdiv(hidden_al, tk)
        hidden_p = nk * tk
        if nk == 1:
            tk, hidden_p = hidden, hidden
    else:
        nk, tk, hidden_p = 1, hidden, hidden
        splits = 1
        while (tk > 128 and
               _need_bytes(max_batch_tile, tk, in_size, out_p,
                           x_item, w_item, out_item) > budget):
            splits += 1
            tk = _round_up(_cdiv(hidden_al, splits), 128)
            nk = _cdiv(hidden_al, tk)
            hidden_p = nk * tk

    # Cast / pad ONCE here (not per forward call).  All pads are zeros, so the
    # extra hidden columns/rows and output columns contribute exactly 0.
    w1p = jnp.asarray(w1, cdt)
    w2p = jnp.asarray(w2, cdt)
    b1p = jnp.asarray(b1, jnp.float32).reshape(1, -1)
    b2p = jnp.asarray(b2, jnp.float32).reshape(1, -1)
    gp = jnp.asarray(gamma, jnp.float32).reshape(1, -1)
    bp = jnp.asarray(beta, jnp.float32).reshape(1, -1)
    if hidden_p != hidden:
        dh = hidden_p - hidden
        w1p = jnp.pad(w1p, ((0, 0), (0, dh)))
        b1p = jnp.pad(b1p, ((0, 0), (0, dh)))
        w2p = jnp.pad(w2p, ((0, dh), (0, 0)))
    if out_p != out_size:
        do = out_p - out_size
        w2p = jnp.pad(w2p, ((0, 0), (0, do)))
        b2p = jnp.pad(b2p, ((0, 0), (0, do)))
        gp = jnp.pad(gp, ((0, 0), (0, do)))
        bp = jnp.pad(bp, ((0, 0), (0, do)))

    return dict(w1=w1p, b1=b1p, w2=w2p, b2=b2p, gamma=gp, beta=bp,
                in_size=in_size, hidden_p=hidden_p, out_size=out_size,
                out_p=out_p, tk=tk, nk=nk, sub=sub,
                vmem_cap=vmem_cap, budget=budget,
                max_batch_tile=int(max_batch_tile))


def mlp_forward(x, params, *, block_batch=None, no_relu=False):
    """ReLU(LayerNorm(fc2(fc1(x)))) with x: [batch, inputSize]."""
    batch, in_size = x.shape
    assert in_size == params["in_size"], "inputSize mismatch with prepared params"
    out_size, out_p = params["out_size"], params["out_p"]
    tk, nk, sub = params["tk"], params["nk"], params["sub"]
    out_dtype = x.dtype
    x_item = jnp.dtype(x.dtype).itemsize
    w_item = jnp.dtype(params["w1"].dtype).itemsize
    out_item = jnp.dtype(out_dtype).itemsize
    budget = params["budget"]

    # Batch tile: aim for >= 4 grid steps (keeps both v7x TensorCores busy and
    # the x/out DMAs pipelined), sublane/MXU aligned, shrunk to the VMEM budget.
    if block_batch is None:
        tb = max(sub, _round_up(_cdiv(batch, 4), sub))
        if tb >= 256:
            tb = (tb // 256) * 256            # full MXU M-dim fill for big tiles
        tb = min(tb, params["max_batch_tile"])
    else:
        tb = max(sub, _round_up(int(block_batch), sub))
    while tb > sub and _need_bytes(tb, tk, in_size, out_p,
                                   x_item, w_item, out_item) > budget:
        tb = max(sub, _round_up(tb // 2, sub))
    if tb > batch:
        tb = batch                            # full-extent batch block is always legal

    need = _need_bytes(tb, tk, in_size, out_p, x_item, w_item, out_item)
    # Never request more than ~90% of this chip's physical VMEM (64 MiB on v7x).
    vmem_limit = int(min(params["vmem_cap"] * 9 // 10,
                         max(32 * _MIB, need + 4 * _MIB)))

    def _single_buffered(shape, index_map):
        # Grid-invariant operand: fetched once, a second pipeline buffer only
        # wastes VMEM.  Capability-gated; never wrapped in try/except.
        if _HAS_BUFFERED:
            return pl.BlockSpec(shape, index_map, pipeline_mode=pl.Buffered(1))
        return pl.BlockSpec(shape, index_map)

    # Weight slices are grid-invariant only when the hidden dim is not tiled;
    # once it is, keep default double-buffering so slice DMAs hide behind MXU work.
    w_spec = _single_buffered if nk == 1 else pl.BlockSpec

    grid = (_cdiv(batch, tb), nk)             # ragged last batch block handled by Pallas
    kernel = functools.partial(mlp_kernel, out_valid=out_size, out_p=out_p,
                               nk=nk, no_relu=no_relu)

    out = pl.pallas_call(
        kernel,
        out_shape=jax.ShapeDtypeStruct((batch, out_p), out_dtype),
        grid_spec=pltpu.PrefetchScalarGridSpec(
            num_scalar_prefetch=0,
            grid=grid,
            in_specs=[
                pl.BlockSpec((tb, in_size), lambda i, k: (i, 0)),    # x tile
                w_spec((in_size, tk), lambda i, k: (0, k)),          # W1 hidden-slice
                w_spec((1, tk), lambda i, k: (0, k)),                # b1 hidden-slice
                w_spec((tk, out_p), lambda i, k: (k, 0)),            # W2 hidden-slice
                _single_buffered((1, out_p), lambda i, k: (0, 0)),   # b2
                _single_buffered((1, out_p), lambda i, k: (0, 0)),   # gamma
                _single_buffered((1, out_p), lambda i, k: (0, 0)),   # beta
            ],
            out_specs=pl.BlockSpec((tb, out_p), lambda i, k: (i, 0)),
            scratch_shapes=[pltpu.VMEM((tb, out_p), jnp.float32)],
        ),
        compiler_params=pltpu.CompilerParams(
            dimension_semantics=("parallel", "arbitrary"),
            vmem_limit_bytes=vmem_limit,
        ),
    )(x, params["w1"], params["b1"], params["w2"], params["b2"],
      params["gamma"], params["beta"])

    return out if out_p == out_size else out[:, :out_size]


def reference_forward(x, w1, b1, w2, b2, gamma, beta, *,
                      compute_dtype=None, no_relu=False):
    """Plain-JAX reference matching the PyTorch module (optionally with the
    same mixed precision as the kernel: low-precision operands, f32 accum)."""
    if compute_dtype is not None:
        x = x.astype(compute_dtype)
        w1 = w1.astype(compute_dtype)
        w2 = w2.astype(compute_dtype)
    h = jnp.dot(x, w1, preferred_element_type=jnp.float32) \
        + b1.reshape(1, -1).astype(jnp.float32)
    if compute_dtype is not None:
        h = h.astype(compute_dtype)
    y = jnp.dot(h, w2, preferred_element_type=jnp.float32) \
        + b2.reshape(1, -1).astype(jnp.float32)
    mean = jnp.mean(y, axis=-1, keepdims=True)
    var = jnp.mean((y - mean) ** 2, axis=-1, keepdims=True)
    y = (y - mean) / jnp.sqrt(var + 1e-5)
    y = y * gamma.reshape(1, -1) + beta.reshape(1, -1)
    return y if no_relu else jnp.maximum(y, 0.0)


if __name__ == "__main__":
    key = jax.random.PRNGKey(0)

    def make_mlp_weights(k, in_size, hidden, out_size):
        k_w1, k_b1, k_w2, k_b2, k_g, k_beta = jax.random.split(k, 6)
        bound1 = 1.0 / (in_size ** 0.5)
        w1 = jax.random.uniform(k_w1, (in_size, hidden), jnp.float32, -bound1, bound1)
        b1 = jax.random.uniform(k_b1, (hidden,), jnp.float32, -bound1, bound1)
        bound2 = 1.0 / (hidden ** 0.5)
        w2 = jax.random.uniform(k_w2, (hidden, out_size), jnp.float32, -bound2, bound2)
        b2 = jax.random.uniform(k_b2, (out_size,), jnp.float32, -bound2, bound2)
        gamma = 1.0 + 0.01 * jax.random.normal(k_g, (out_size,), jnp.float32)
        beta = 0.01 * jax.random.normal(k_beta, (out_size,), jnp.float32)
        return w1, b1, w2, b2, gamma, beta

    k1, k2, kx1, kx2 = jax.random.split(key, 4)

    # --- Test 1: module defaults (batch=8, inputSize=32, hiddenSize=64, outputSize=16)
    batch, in_size, hidden, out_size = 8, 32, 64, 16
    w1, b1, w2, b2, gamma, beta = make_mlp_weights(k1, in_size, hidden, out_size)
    x = jax.random.normal(kx1, (batch, in_size), jnp.float32)

    # Exact f32 path.
    p_f32 = prepare_mlp_params(w1, b1, w2, b2, gamma, beta, compute_dtype=jnp.float32)
    out = jax.block_until_ready(mlp_forward(x, p_f32))
    ref = reference_forward(x, w1, b1, w2, b2, gamma, beta)
    assert out.shape == (batch, out_size)
    assert jnp.allclose(out, ref, atol=1e-5, rtol=1e-5), "f32 mismatch vs reference"

    # Default bf16-operand path (f32 accumulation + f32 LayerNorm).
    p_bf16 = prepare_mlp_params(w1, b1, w2, b2, gamma, beta)
    out_bf = jax.block_until_ready(mlp_forward(x, p_bf16))
    ref_bf = reference_forward(x, w1, b1, w2, b2, gamma, beta, compute_dtype=jnp.bfloat16)
    assert out_bf.shape == (batch, out_size)
    assert jnp.allclose(out_bf, ref_bf, atol=2e-2, rtol=2e-2), "bf16 mismatch vs reference"

    # --- Test 2: hidden-dim (K) tiling + multi-step, ragged batch grid + padded LN mask
    batch2, in2, hid2, out2 = 50, 96, 256, 192
    w1b, b1b, w2b, b2b, gb, betab = make_mlp_weights(k2, in2, hid2, out2)
    x2 = jax.random.normal(kx2, (batch2, in2), jnp.float32)
    p2 = prepare_mlp_params(w1b, b1b, w2b, b2b, gb, betab,
                            compute_dtype=jnp.float32, hidden_block=128)
    assert p2["nk"] == 2, "expected the hidden-dim reduction axis to be exercised"
    out2_k = jax.block_until_ready(mlp_forward(x2, p2))
    ref2 = reference_forward(x2, w1b, b1b, w2b, b2b, gb, betab)
    assert out2_k.shape == (batch2, out2)
    assert jnp.allclose(out2_k, ref2, atol=2e-3, rtol=2e-3), "K-tiled mismatch vs reference"

    print("KERNEL_OK")
</pallas_src>

<mosaic_0001>
module attributes {stable_mosaic.version = 11 : i64} {
  func.func @mlp_kernel(%arg0: i32, %arg1: i32, %arg2: memref<8x32xf32, #tpu.memory_space<vmem>>, %arg3: memref<32x64xf32, #tpu.memory_space<vmem>>, %arg4: memref<1x64xf32, #tpu.memory_space<vmem>>, %arg5: memref<64x128xf32, #tpu.memory_space<vmem>>, %arg6: memref<1x128xf32, #tpu.memory_space<vmem>>, %arg7: memref<1x128xf32, #tpu.memory_space<vmem>>, %arg8: memref<1x128xf32, #tpu.memory_space<vmem>>, %arg9: memref<8x128xf32, #tpu.memory_space<vmem>>, %arg10: memref<8x128xf32, #tpu.memory_space<vmem>>) attributes {dimension_semantics = [#tpu.dimension_semantics<parallel>, #tpu.dimension_semantics<arbitrary>], iteration_bounds = array<i64: 1, 1>, scalar_prefetch = 0 : i64, scratch_operands = 1 : i64, tpu.core_type = #tpu.core_type<tc>, window_params = [{transform_indices = @transform_0, window_bounds = array<i64: 8, 32>}, {pipeline_mode = #tpu.pipeline_mode<synchronous>, transform_indices = @transform_1, window_bounds = array<i64: 32, 64>}, {pipeline_mode = #tpu.pipeline_mode<synchronous>, transform_indices = @transform_2, window_bounds = array<i64: 1, 64>}, {pipeline_mode = #tpu.pipeline_mode<synchronous>, transform_indices = @transform_3, window_bounds = array<i64: 64, 128>}, {pipeline_mode = #tpu.pipeline_mode<synchronous>, transform_indices = @transform_4, window_bounds = array<i64: 1, 128>}, {pipeline_mode = #tpu.pipeline_mode<synchronous>, transform_indices = @transform_5, window_bounds = array<i64: 1, 128>}, {pipeline_mode = #tpu.pipeline_mode<synchronous>, transform_indices = @transform_6, window_bounds = array<i64: 1, 128>}, {transform_indices = @transform_7, window_bounds = array<i64: 8, 128>}]} {
    %c0 = arith.constant 0 : index
    %c0_0 = arith.constant 0 : index
    %0 = vector.load %arg2[%c0, %c0_0] : memref<8x32xf32, #tpu.memory_space<vmem>>, vector<8x32xf32>
    %c0_1 = arith.constant 0 : index
    %c0_2 = arith.constant 0 : index
    %1 = vector.load %arg3[%c0_1, %c0_2] : memref<32x64xf32, #tpu.memory_space<vmem>>, vector<32x64xf32>
    %cst = arith.constant dense<0.000000e+00> : vector<8x64xf32>
    %2 = tpu.matmul %0, %1, %cst {dimension_numbers = #tpu.dot_dimension_numbers<[1], [0], [0], [1], [0, 0, 1, 1], [], []>} : vector<8x32xf32>, vector<32x64xf32>, vector<8x64xf32> -> vector<8x64xf32>
    %c0_3 = arith.constant 0 : index
    %c0_4 = arith.constant 0 : index
    %3 = vector.load %arg4[%c0_3, %c0_4] : memref<1x64xf32, #tpu.memory_space<vmem>>, vector<1x64xf32>
    %4 = vector.broadcast %3 : vector<1x64xf32> to vector<8x64xf32>
    %5 = arith.addf %2, %4 : vector<8x64xf32>
    %c0_5 = arith.constant 0 : index
    %c0_6 = arith.constant 0 : index
    %6 = vector.load %arg5[%c0_5, %c0_6] : memref<64x128xf32, #tpu.memory_space<vmem>>, vector<64x128xf32>
    %cst_7 = arith.constant dense<0.000000e+00> : vector<8x128xf32>
    %7 = tpu.matmul %5, %6, %cst_7 {dimension_numbers = #tpu.dot_dimension_numbers<[1], [0], [0], [1], [0, 0, 1, 1], [], []>} : vector<8x64xf32>, vector<64x128xf32>, vector<8x128xf32> -> vector<8x128xf32>
    %c0_8 = arith.constant 0 : index
    %c0_9 = arith.constant 0 : index
    %8 = vector.load %arg6[%c0_8, %c0_9] : memref<1x128xf32, #tpu.memory_space<vmem>>, vector<1x128xf32>
    %9 = vector.broadcast %8 : vector<1x128xf32> to vector<8x128xf32>
    %10 = arith.addf %7, %9 : vector<8x128xf32>
    %cst_10 = arith.constant dense<0.000000e+00> : vector<8xf32>
    %11 = vector.multi_reduction <add>, %10, %cst_10 [1] : vector<8x128xf32> to vector<8xf32>
    %12 = vector.shape_cast %11 : vector<8xf32> to vector<8x1xf32>
    %cst_11 = arith.constant 6.250000e-02 : f32
    %13 = vector.broadcast %cst_11 : f32 to vector<8x1xf32>
    %14 = arith.mulf %12, %13 : vector<8x1xf32>
    %15 = vector.broadcast %14 : vector<8x1xf32> to vector<8x128xf32>
    %16 = arith.subf %10, %15 : vector<8x128xf32>
    %17 = tpu.iota {dimensions = array<i32: 1>} : vector<8x128xi32>
    %c16_i32 = arith.constant 16 : i32
    %18 = vector.broadcast %c16_i32 : i32 to vector<8x128xi32>
    %19 = arith.cmpi slt, %17, %18 : vector<8x128xi32>
    %cst_12 = arith.constant 0.000000e+00 : f32
    %20 = vector.broadcast %cst_12 : f32 to vector<8x128xf32>
    %21 = arith.select %19, %16, %20 : vector<8x128xi1>, vector<8x128xf32>
    %22 = arith.mulf %21, %21 : vector<8x128xf32>
    %cst_13 = arith.constant dense<0.000000e+00> : vector<8xf32>
    %23 = vector.multi_reduction <add>, %22, %cst_13 [1] : vector<8x128xf32> to vector<8xf32>
    %24 = vector.shape_cast %23 : vector<8xf32> to vector<8x1xf32>
    %cst_14 = arith.constant 6.250000e-02 : f32
    %25 = vector.broadcast %cst_14 : f32 to vector<8x1xf32>
    %26 = arith.mulf %24, %25 : vector<8x1xf32>
    %cst_15 = arith.constant 9.99999974E-6 : f32
    %27 = vector.broadcast %cst_15 : f32 to vector<8x1xf32>
    %28 = arith.addf %26, %27 : vector<8x1xf32>
    %29 = math.rsqrt %28 : vector<8x1xf32>
    %30 = vector.broadcast %29 : vector<8x1xf32> to vector<8x128xf32>
    %31 = arith.mulf %21, %30 : vector<8x128xf32>
    %c0_16 = arith.constant 0 : index
    %c0_17 = arith.constant 0 : index
    %32 = vector.load %arg7[%c0_16, %c0_17] : memref<1x128xf32, #tpu.memory_space<vmem>>, vector<1x128xf32>
    %33 = vector.broadcast %32 : vector<1x128xf32> to vector<8x128xf32>
    %34 = arith.mulf %31, %33 : vector<8x128xf32>
    %c0_18 = arith.constant 0 : index
    %c0_19 = arith.constant 0 : index
    %35 = vector.load %arg8[%c0_18, %c0_19] : memref<1x128xf32, #tpu.memory_space<vmem>>, vector<1x128xf32>
    %36 = vector.broadcast %35 : vector<1x128xf32> to vector<8x128xf32>
    %37 = arith.addf %34, %36 : vector<8x128xf32>
    %cst_20 = arith.constant 0.000000e+00 : f32
    %38 = vector.broadcast %cst_20 : f32 to vector<8x128xf32>
    %39 = arith.maximumf %37, %38 : vector<8x128xf32>
    %c0_21 = arith.constant 0 : index
    %c0_22 = arith.constant 0 : index
    %40 = vector.load %arg9[%c0_21, %c0_22] : memref<8x128xf32, #tpu.memory_space<vmem>>, vector<8x128xf32>
    tpu.vector_store %arg9[%c0_21, %c0_22], %39 {strides = array<i32>} : memref<8x128xf32, #tpu.memory_space<vmem>>, vector<8x128xf32>,
    return
  }
  func.func @transform_0(%arg0: i32, %arg1: i32) -> (i32, i32) {
    %c0_i32 = arith.constant 0 : i32
    %c0_i32_0 = arith.constant 0 : i32
    return %arg0, %c0_i32 : i32, i32
  }
  func.func @transform_1(%arg0: i32, %arg1: i32) -> (i32, i32) {
    %c0_i32 = arith.constant 0 : i32
    %c0_i32_0 = arith.constant 0 : i32
    return %c0_i32, %arg1 : i32, i32
  }
  func.func @transform_2(%arg0: i32, %arg1: i32) -> (i32, i32) {
    %c0_i32 = arith.constant 0 : i32
    %c0_i32_0 = arith.constant 0 : i32
    return %c0_i32, %arg1 : i32, i32
  }
  func.func @transform_3(%arg0: i32, %arg1: i32) -> (i32, i32) {
    %c0_i32 = arith.constant 0 : i32
    %c0_i32_0 = arith.constant 0 : i32
    return %arg1, %c0_i32 : i32, i32
  }
  func.func @transform_4(%arg0: i32, %arg1: i32) -> (i32, i32) {
    %c0_i32 = arith.constant 0 : i32
    %c0_i32_0 = arith.constant 0 : i32
    %c0_i32_1 = arith.constant 0 : i32
    return %c0_i32, %c0_i32_0 : i32, i32
  }
  func.func @transform_5(%arg0: i32, %arg1: i32) -> (i32, i32) {
    %c0_i32 = arith.constant 0 : i32
    %c0_i32_0 = arith.constant 0 : i32
    %c0_i32_1 = arith.constant 0 : i32
    return %c0_i32, %c0_i32_0 : i32, i32
  }
  func.func @transform_6(%arg0: i32, %arg1: i32) -> (i32, i32) {
    %c0_i32 = arith.constant 0 : i32
    %c0_i32_0 = arith.constant 0 : i32
    %c0_i32_1 = arith.constant 0 : i32
    return %c0_i32, %c0_i32_0 : i32, i32
  }
  func.func @transform_7(%arg0: i32, %arg1: i32) -> (i32, i32) {
    %c0_i32 = arith.constant 0 : i32
    %c0_i32_0 = arith.constant 0 : i32
    return %arg0, %c0_i32 : i32, i32
  }
}

</mosaic_0001>

<bundles_post_ra>
// kernel: tpu_custom_call.1
= control target key start
LH: loop header
LB: loop body
LE: loop exit
PB: predicated region body
PF: predicated region fallthrough
CT: control target
= control target key end

     0   :  { %12 = vsyncpa [#allocation4], 0  ;;  %s381_s0 = inlined_call_operand.hbm [shape: f32[8,32], index: 0, kind: input, shape index: {}]   ;;  %s382_s1 = inlined_call_operand.hbm [shape: f32[32,64], index: 1, kind: input, shape index: {}]   ;;  %s383_s2 = inlined_call_operand.vmem [shape: f32[1,64], index: 2, kind: input, shape index: {}]   ;;  %s384_s3 = inlined_call_operand.hbm [shape: f32[64,128], index: 3, kind: input, shape index: {}]   ;;  %s385_s4 = inlined_call_operand.vmem [shape: f32[1,128], index: 4, kind: input, shape index: {}]   ;;  %s386_s5 = inlined_call_operand.vmem [shape: f32[1,128], index: 5, kind: input, shape index: {}]   ;;  %s387_s6 = inlined_call_operand.vmem [shape: f32[1,128], index: 6, kind: input, shape index: {}]   ;;  %s388_s7 = inlined_call_operand.hbm [shape: f32[8,128], index: 7, kind: output, shape index: {}]  }
   0x1   :  { %13 = vsyncpa [#allocation7], 0  ;;  %s30_s26 = sshll.u32 %s382_s1, 4  ;;  %s31_s26 = int_to_ptr.hbm [resolvable:$true] %s30_s26 }
   0x2   :  { %14 = vsyncpa [#allocation5], 0  ;;  %s311_s27 = smov [#allocation6]   ;;  %s20_s8 = sshll.u32 %s381_s0, 4  ;;  %s21_s8 = int_to_ptr.hbm [resolvable:$true] %s20_s8 }
   0x3   :  { %s32_s28 = sshll.u32 %s311_s27, 4  ;;  %s312_s9 = smov 128   ;;  %s33_s28 = int_to_ptr.vmem [resolvable:$true] %s32_s28 }
   0x4   :  { %s313_s10 = smov 8   ;;  %s314_s11 = smov [#allocation3]  }
   0x5   :  { %38 = dma.hbm_to_vmem [thread:$0]  %s31_s26, 512, %s33_s28, [#allocation7], %s312_s9, %s312_s9, %s313_s10  }
   0x6   :  { %s22_s12 = sshll.u32 %s314_s11, 4  ;;  %s45_s15 = sshll.u32 %s384_s3, 4  ;;  %s23_s12 = int_to_ptr.vmem [resolvable:$true] %s22_s12  ;;  %s46_s15 = int_to_ptr.hbm [resolvable:$true] %s45_s15 }
   0x7   :  { %25 = dma.hbm_to_vmem [thread:$0]  %s21_s8, 128, %s23_s12, [#allocation4]  }
   0x8   :  { %s315_s1 = smov [#allocation8]  }
   0x9   :  { %s47_s16 = sshll.u32 %s315_s1, 4  ;;  %s48_s16 = int_to_ptr.vmem [resolvable:$true] %s47_s16 }
   0xa   :  { %53 = dma.hbm_to_vmem [thread:$0]  %s46_s15, 1024, %s48_s16, [#allocation7], %s312_s9, %s312_s9, %s313_s10  }
   0xb   :  { %305 = dma.done.wait [#allocation4], 128  }
   0xc   :  { %306 = vsyncadd [#allocation4], 4294967168 }
   0xd   :  { %307 = dma.done.wait [#allocation7], 1536  }
   0xe   :  { %308 = vsyncadd [#allocation7], 4294965760  ;;  %v76_v0 = vld [vmem:[#allocation6 + $0x18] sm:$0xff]  ;;  %v75_v1 = vld [vmem:[#allocation6 + $0x10] sm:$0xff]  ;;  %vm81_vm0 = vcmask 261120   ;;  %vm117_vm1 = vcmask 523264   ;;  %v145_v19 = vlaneseq }
   0xf   :  { %97 = vmatpush.msra.mxu0 %v76_v0  ;;  %v112_v2 = vld [vmem:[#allocation8 + $0x38] sm:$0xff]  ;;  %v74_v3 = vld [vmem:[#allocation6 + $0x8] sm:$0xff]  ;;  %v111_v4 = vld [vmem:[#allocation8 + $0x30] sm:$0xff]  ;;  %s316_s21 = smov [#allocation9]   ;;  %s184_s25 = sshll.u32 %s388_s7, 4  ;;  %s185_s25 = int_to_ptr.hbm [resolvable:$true] %s184_s25 }
  0x10   :  { %129 = vmatpush.msra.mxu1 %v112_v2  ;;  %v110_v5 = vld [vmem:[#allocation8 + $0x28] sm:$0xff]  ;;  %v73_v6 = vld [vmem:[#allocation6] sm:$0xff]  ;;  %v72_v7 = vld [vmem:[#allocation3] sm:$0xff]  ;;  %v146_v20 = vand.u32 127, %v145_v19  ;;  %s182_s22 = sshll.u32 %s316_s21, 4  ;;  %s183_s22 = int_to_ptr.vmem [resolvable:$true] %s182_s22 }
  0x11   :  { %98 = vmatpush.msra.mxu0 %v75_v1  ;;  %v109_v8 = vld [vmem:[#allocation8 + $0x20] sm:$0xff]  ;;  %v108_v9 = vld [vmem:[#allocation8 + $0x18] sm:$0xff]  ;;  %v107_v10 = vld [vmem:[#allocation8 + $0x10] sm:$0xff] }
  0x12   :  { %130 = vmatpush.msra.mxu1 %v111_v4  ;;  %v106_v11 = vld [vmem:[#allocation8 + $0x8] sm:$0xff]  ;;  %v105_v12 = vld [vmem:[#allocation8] sm:$0xff]  ;;  %v203_v13 = vld [vmem:[%s383_s2] ss:$0 sm:$0xff]  ;;  %vm147_vm2 = vcmp.lt.s32.totalorder %v146_v20, 16 }
  0x13   :  { %99 = vmatpush.msra.mxu0 %v74_v3  ;;  %v204_v16 = vld [vmem:[%s385_s4] ss:$0 sm:$0xff] }
  0x14   :  { %131 = vmatpush.msra.mxu1 %v110_v5  ;;  %v205_v35 = vld [vmem:[%s386_s5] ss:$0 sm:$0xff] }
  0x15   :  { %100 = vmatpush.msra.mxu0 %v73_v6  ;;  %v206_v38 = vld [vmem:[%s387_s6] ss:$0 sm:$0xff] }
  0x16   :  { %195 = vmatmul.msk.f32.vlgmr.msra.gmra.mxu0 %vm81_vm0, %v72_v7  ;;  %132 = vmatpush.msra.mxu1 %v109_v8 }
  0x18   :  { %133 = vmatpush.msra.mxu1 %v108_v9 }
  0x1a   :  { %134 = vmatpush.msra.mxu1 %v107_v10 }
  0x1c   :  { %135 = vmatpush.msra.mxu1 %v106_v11 }
  0x1e   :  { %136 = vmatpush.msra.mxu1 %v105_v12 }
  0x93   :  { %v102_v14 = vpop.f32.mrf.mxu0 }
  0x94   :  { %v103_v15 = vadd.f32 %v203_v13, %v102_v14 }
  0x96   :  { %196 = vmatmul.msk.f32.vlgmr.msra.gmra.mxu1 %vm117_vm1, %v103_v15 }
 0x113   :  { %v138_v17 = vpop.f32.mrf.mxu1 }
 0x114   :  { %v139_v18 = vadd.f32 %v204_v16, %v138_v17 }
 0x116   :  { %141 = vadd.xlane.f32.xlu0 %v139_v18 }
 0x189   :  { %v142_v21 = vpop.xlane.xlu0 %141 }
 0x18a   :  { %v143_v22 = vmul.f32 0.0625, %v142_v21 }
 0x18c   :  { %v144_v23 = vsub.f32 %v139_v18, %v143_v22 }
 0x18e   :  { %v148_v24 = vsel %vm147_vm2, %v144_v23, 0.0 }
 0x18f   :  { %v149_v25 = vmul.f32 %v148_v24, %v148_v24 }
 0x191   :  { %150 = vadd.xlane.f32.xlu0 %v149_v25 }
 0x204   :  { %v151_v26 = vpop.xlane.xlu0 %150 }
 0x205   :  { %v152_v27 = vmul.f32 0.0625, %v151_v26 }
 0x207   :  { %v153_v28 = vadd.f32 1e-05, %v152_v27 }
 0x209   :  { %207 = vrsqrt.f32 %v153_v28  ;;  %vm160_vm4 = vweird.f32 %v153_v28 }
 0x20f   :  { %v208_v29 = vpop.eup %207 }
 0x210   :  { %v155_v30 = vmul.f32 %v208_v29, %v153_v28  ;;  %vm161_vm3 = vweird.f32 %v208_v29 }
 0x211   :  { %vm162_vm5 = vmor %vm160_vm4, %vm161_vm3 }
 0x212   :  { %v156_v31 = vmul.f32 %v208_v29, %v155_v30 }
 0x214   :  { %v157_v32 = vmul.f32 0.5, %v156_v31 }
 0x216   :  { %v158_v33 = vsub.f32 1.5, %v157_v32 }
 0x218   :  { %v159_v34 = vmul.f32 %v208_v29, %v158_v33 }
 0x21a   :  { %v163_v36 = vsel %vm162_vm5, %v208_v29, %v159_v34 }
 0x21b   :  { %v164_v37 = vmul.f32 %v163_v36, %v148_v24 }
 0x21d   :  { %v169_v39 = vmul.f32 %v205_v35, %v164_v37 }
 0x21f   :  { %v174_v40 = vadd.f32 %v206_v38, %v169_v39 }
 0x221   :  { %v175_v41 = vmax.f32 %v174_v40, 0.0 }
 0x223   :  { %176 = vst [vmem:[#allocation9] sm:$0xff] %v175_v41 }
 0x224   :  { %187 = dma.vmem_to_hbm [thread:$0]  %s183_s22, 128, %s185_s25, [#allocation5]  }
 0x225   :  { %309 = dma.done.wait [#allocation5], 128  }
 0x226   :  { %310 = vsyncadd [#allocation5], 4294967168 }
 0x227   :  { %192 = vsyncpa [#allocation4], 1 }
 0x228   :  { %193 = vsyncpa [#allocation7], 1 }
 0x229   :  { %194 = vsyncpa [#allocation5], 1 }

</bundles_post_ra>
